<compile_context>
chip_gen: v7x
topology: tpu7x:2x2x1
jax: 0.10.0
libtpu: 0.0.40
codegen_flags: <defaults>
</compile_context>

<pallas_src>
import jax
import jax.numpy as jnp
from jax.experimental import pallas as pl
from jax.experimental.pallas import tpu as pltpu

C_OUT = 64      # out_channels of the Conv1d
TN = 8          # batch rows per grid step (sublane-dense)
TL_MAX = 2048   # lane-axis tile cap: 8 * 64 * 2048 * 4 B = 4 MiB output block


def feature_expander_kernel(x_ref, w_ref, b_ref, o_ref):
    # x_ref: (TN, TL)      -- TN batch rows of the single input channel
    # w_ref: (C_OUT, 1)    -- conv weight as a column vector (VMEM-resident)
    # b_ref: (C_OUT, 1)    -- bias as a column vector (VMEM-resident)
    # o_ref: (TN, C_OUT, TL)
    x = x_ref[...]                       # (TN, TL)
    w = w_ref[...]                       # (C_OUT, 1)
    b = b_ref[...]                       # (C_OUT, 1)
    # (TN, 1, TL) * (1, C_OUT, 1) + (1, C_OUT, 1) -> (TN, C_OUT, TL)
    # Pure VPU broadcast FMA; deliberately NOT an MXU K=1 matmul.
    o_ref[...] = x[:, None, :] * w[None, :, :] + b[None, :, :]


def feature_expander(x, weight, bias):
    """x: (N, 1, L); weight: (64, 1, 1); bias: (64,) -> (N, 64, L)."""
    N, C_in, L = x.shape
    assert C_in == 1
    dtype = x.dtype

    # ---- tile sizing: lane dim padded to a multiple of 128, capped at TL_MAX
    l_pad128 = ((L + 127) // 128) * 128
    tl = min(TL_MAX, l_pad128)
    l_pad = ((L + tl - 1) // tl) * tl
    tn = TN
    n_pad = ((N + tn - 1) // tn) * tn

    x2d = x.reshape(N, L)
    if (n_pad, l_pad) != (N, L):
        x2d = jnp.pad(x2d, ((0, n_pad - N), (0, l_pad - L)))
    w2d = weight.reshape(C_OUT, 1).astype(dtype)
    b2d = bias.reshape(C_OUT, 1).astype(dtype)

    grid = (n_pad // tn, l_pad // tl)

    cost = pl.CostEstimate(
        flops=2 * N * C_OUT * L,
        transcendentals=0,
        bytes_accessed=4 * (n_pad * l_pad * (C_OUT + 1) + 2 * C_OUT),
    )

    out = pl.pallas_call(
        feature_expander_kernel,
        out_shape=jax.ShapeDtypeStruct((n_pad, C_OUT, l_pad), dtype),
        grid_spec=pltpu.PrefetchScalarGridSpec(
            num_scalar_prefetch=0,
            grid=grid,
            in_specs=[
                pl.BlockSpec((tn, tl), lambda i, j: (i, j)),       # x tile
                pl.BlockSpec((C_OUT, 1), lambda i, j: (0, 0)),     # weight (resident)
                pl.BlockSpec((C_OUT, 1), lambda i, j: (0, 0)),     # bias (resident)
            ],
            out_specs=pl.BlockSpec((tn, C_OUT, tl), lambda i, j: (i, 0, j)),
        ),
        compiler_params=pltpu.CompilerParams(
            dimension_semantics=("parallel", "parallel"),
            vmem_limit_bytes=32 * 1024 * 1024,
        ),
        cost_estimate=cost,
    )(x2d, w2d, b2d)

    if (n_pad, l_pad) != (N, L):
        out = out[:N, :, :L]
    return out


if __name__ == "__main__":
    key = jax.random.PRNGKey(0)
    k_x, k_w, k_b = jax.random.split(key, 3)

    # Small shapes consistent with the module (N batches, C_in=1, length L).
    N, L = 2, 128
    x = jax.random.normal(k_x, (N, 1, L), dtype=jnp.float32)

    # PyTorch Conv1d default init: U(-1/sqrt(fan_in), +1/sqrt(fan_in)),
    # fan_in = in_channels * kernel_size = 1 -> bound = 1.0
    weight = jax.random.uniform(k_w, (C_OUT, 1, 1), dtype=jnp.float32,
                                minval=-1.0, maxval=1.0)
    bias = jax.random.uniform(k_b, (C_OUT,), dtype=jnp.float32,
                              minval=-1.0, maxval=1.0)

    y = feature_expander(x, weight, bias)
    y = jax.block_until_ready(y)

    # Plain-JAX reference (same semantics as nn.Conv1d with k=1, C_in=1).
    # Note: torch.cuda.empty_cache() in the original forward is a no-op here.
    y_ref = weight.reshape(1, C_OUT, 1) * x + bias.reshape(1, C_OUT, 1)
    assert y.shape == (N, C_OUT, L)
    assert jnp.allclose(y, y_ref, atol=1e-6), "mismatch vs reference"

    print("KERNEL_OK")
</pallas_src>

<mosaic_0001>
module attributes {stable_mosaic.version = 11 : i64} {
  func.func @feature_expander_kernel(%arg0: i32, %arg1: i32, %arg2: memref<8x128xf32, #tpu.memory_space<vmem>>, %arg3: memref<64x1xf32, #tpu.memory_space<vmem>>, %arg4: memref<64x1xf32, #tpu.memory_space<vmem>>, %arg5: memref<8x64x128xf32, #tpu.memory_space<vmem>>) attributes {dimension_semantics = [#tpu.dimension_semantics<parallel>, #tpu.dimension_semantics<parallel>], iteration_bounds = array<i64: 1, 1>, scalar_prefetch = 0 : i64, scratch_operands = 0 : i64, tpu.core_type = #tpu.core_type<tc>, window_params = [{transform_indices = @transform_0, window_bounds = array<i64: 8, 128>}, {pipeline_mode = #tpu.pipeline_mode<synchronous>, transform_indices = @transform_1, window_bounds = array<i64: 64, 1>}, {pipeline_mode = #tpu.pipeline_mode<synchronous>, transform_indices = @transform_2, window_bounds = array<i64: 64, 1>}, {transform_indices = @transform_3, window_bounds = array<i64: 8, 64, 128>}]} {
    %c0 = arith.constant 0 : index
    %c0_0 = arith.constant 0 : index
    %0 = vector.load %arg2[%c0, %c0_0] : memref<8x128xf32, #tpu.memory_space<vmem>>, vector<8x128xf32>
    %c0_1 = arith.constant 0 : index
    %c0_2 = arith.constant 0 : index
    %1 = vector.load %arg3[%c0_1, %c0_2] : memref<64x1xf32, #tpu.memory_space<vmem>>, vector<64x1xf32>
    %c0_3 = arith.constant 0 : index
    %c0_4 = arith.constant 0 : index
    %2 = vector.load %arg4[%c0_3, %c0_4] : memref<64x1xf32, #tpu.memory_space<vmem>>, vector<64x1xf32>
    %3 = vector.shape_cast %0 : vector<8x128xf32> to vector<8x1x128xf32>
    %4 = vector.shape_cast %1 : vector<64x1xf32> to vector<1x64x1xf32>
    %5 = vector.broadcast %3 : vector<8x1x128xf32> to vector<8x64x128xf32>
    %6 = vector.broadcast %4 : vector<1x64x1xf32> to vector<8x64x128xf32>
    %7 = arith.mulf %5, %6 : vector<8x64x128xf32>
    %8 = vector.shape_cast %2 : vector<64x1xf32> to vector<1x64x1xf32>
    %9 = vector.broadcast %8 : vector<1x64x1xf32> to vector<8x64x128xf32>
    %10 = arith.addf %7, %9 : vector<8x64x128xf32>
    %c0_5 = arith.constant 0 : index
    %c0_6 = arith.constant 0 : index
    %c0_7 = arith.constant 0 : index
    %11 = vector.load %arg5[%c0_5, %c0_6, %c0_7] : memref<8x64x128xf32, #tpu.memory_space<vmem>>, vector<8x64x128xf32>
    tpu.vector_store %arg5[%c0_5, %c0_6, %c0_7], %10 {strides = array<i32>} : memref<8x64x128xf32, #tpu.memory_space<vmem>>, vector<8x64x128xf32>,
    return
  }
  func.func @transform_0(%arg0: i32, %arg1: i32) -> (i32, i32) {
    %c0_i32 = arith.constant 0 : i32
    return %arg0, %arg1 : i32, i32
  }
  func.func @transform_1(%arg0: i32, %arg1: i32) -> (i32, i32) {
    %c0_i32 = arith.constant 0 : i32
    %c0_i32_0 = arith.constant 0 : i32
    %c0_i32_1 = arith.constant 0 : i32
    return %c0_i32, %c0_i32_0 : i32, i32
  }
  func.func @transform_2(%arg0: i32, %arg1: i32) -> (i32, i32) {
    %c0_i32 = arith.constant 0 : i32
    %c0_i32_0 = arith.constant 0 : i32
    %c0_i32_1 = arith.constant 0 : i32
    return %c0_i32, %c0_i32_0 : i32, i32
  }
  func.func @transform_3(%arg0: i32, %arg1: i32) -> (i32, i32, i32) {
    %c0_i32 = arith.constant 0 : i32
    %c0_i32_0 = arith.constant 0 : i32
    return %arg0, %c0_i32, %arg1 : i32, i32, i32
  }
}

</mosaic_0001>

<bundles_post_ra>
// kernel: tpu_custom_call.1
= control target key start
LH: loop header
LB: loop body
LE: loop exit
PB: predicated region body
PF: predicated region fallthrough
CT: control target
= control target key end

     0   :  { %v442_v2 = vmov 0   ;;  %s785_s0 = inlined_call_operand.vmem [shape: f32[8,128], index: 0, kind: input, shape index: {}]   ;;  %s786_s1 = inlined_call_operand.vmem [shape: f32[64,1], index: 1, kind: input, shape index: {}]   ;;  %s787_s2 = inlined_call_operand.vmem [shape: f32[64,1], index: 2, kind: input, shape index: {}]   ;;  %s788_s3 = inlined_call_operand.hbm [shape: f32[8,64,128], index: 3, kind: output, shape index: {}]  }
   0x1   :  { %v18_v0 = vld [vmem:[%s786_s1 + $0x10] sm:$0xff]  ;;  %v16_v1 = vld [vmem:[%s786_s1] sm:$0xff]  ;;  %416 = vset.pattern.permute.xlu1 %v442_v2  ;;  %415 = vset.pattern.permute.xlu0 %v442_v2  ;;  %v19_v3 = vld [vmem:[%s786_s1 + $0x18] sm:$0xff] }
   0x2   :  { %134 = vperm.xlu1 %416, %v18_v0   ;;  %124 = vperm.xlu0 %415, %v16_v1   ;;  %v17_v4 = vld [vmem:[%s786_s1 + $0x8] sm:$0xff] }
   0x3   :  { %8 = vsyncpa [#allocation3], 0  ;;  %v21_v5 = vld [vmem:[%s786_s1 + $0x28] sm:$0xff]  ;;  %v20_v6 = vld [vmem:[%s786_s1 + $0x20] sm:$0xff]  ;;  %v443_v17 = vmov 1966171168   ;;  %v37_v19 = vlaneseq }
   0x4   :  { %v23_v7 = vld [vmem:[%s786_s1 + $0x38] sm:$0xff]  ;;  %v22_v8 = vld [vmem:[%s786_s1 + $0x30] sm:$0xff]  ;;  %v25_v9 = vld [vmem:[%s787_s2 + $0x8] sm:$0xff]  ;;  %v35_v18 = vunpack.c.l.s4 %v443_v17 }
   0x5   :  { %v24_v10 = vld [vmem:[%s787_s2] sm:$0xff]  ;;  %v27_v11 = vld [vmem:[%s787_s2 + $0x18] sm:$0xff]  ;;  %v26_v12 = vld [vmem:[%s787_s2 + $0x10] sm:$0xff]  ;;  %v38_v21 = vshrl.u32 %v37_v19, 7 }
   0x6   :  { %139 = vperm.xlu1 %416, %v19_v3   ;;  %129 = vperm.xlu0 %415, %v17_v4   ;;  %v29_v13 = vld [vmem:[%s787_s2 + $0x28] sm:$0xff]  ;;  %v28_v14 = vld [vmem:[%s787_s2 + $0x20] sm:$0xff]  ;;  %v31_v15 = vld [vmem:[%s787_s2 + $0x38] sm:$0xff]  ;;  %v36_v20 = vunpack.c.0.s8 %v35_v18 }
   0x7   :  { %v30_v16 = vld [vmem:[%s787_s2 + $0x30] sm:$0xff]  ;;  %v15_v22 = vld [vmem:[%s785_s0] sm:$0xff]  ;;  %v84_v33 = vsub.s32 0, %v38_v21  ;;  %s444_s0 = smov [#allocation2]  }
   0x8   :  { %v39_v23 = vsub.s32 %v36_v20, %v38_v21  ;;  %v33_v24 = vcombine.high %v15_v22, %v15_v22  ;;  %s399_s2 = sshll.u32 %s444_s0, 4  ;;  %s762_s2 = int_to_ptr.vmem [resolvable:$true] %s399_s2 }
   0x9   :  { %s418_s18 = scalar_lea.vmem %s762_s2, 8192  ;;  %p423_p1 = scmp.lt.s32.totalorder %s762_s2, %s762_s2 }
   0xa   :  { %149 = vperm.xlu1 %416, %v21_v5   ;;  %144 = vperm.xlu0 %415, %v20_v6   ;;  %v40_v25 = vrot.slane %v15_v22, %v39_v23  ;;  %v47_v26 = vrot.slane %v33_v24, %v39_v23  ;;  %p419_p0 = scmp.ne.s32.totalorder %s762_s2, %s418_s18  ;;  %p424_p2 = scmp.lt.s32.totalorder %s418_s18, %s418_s18 }
   0xc   :  { %v48_v27 = vcombine.high %v40_v25, %v40_v25  ;;  %v49_v28 = vcombine.high %v47_v26, %v47_v26  ;;  %v56_v29 = vrot.slane %v40_v25, %v39_v23  ;;  %v63_v31 = vrot.slane %v47_v26, %v39_v23  ;;  %p425_p3 = por %p424_p2, %p423_p1 }
   0xe   :  { %159 = vperm.xlu1 %416, %v23_v7   ;;  %154 = vperm.xlu0 %415, %v22_v8   ;;  %v70_v30 = vrot.slane %v48_v27, %v39_v23  ;;  %v77_v32 = vrot.slane %v49_v28, %v39_v23  ;;  %v78_v34 = vcombine.high %v56_v29, %v56_v29  ;;  %p426_p4 = pnand %p425_p3, %p419_p0 }
   0xf   :  { %v79_v36 = vcombine.high %v63_v31, %v63_v31  ;;  %v518_v38 = vrot.slane %v56_v29, %v84_v33  ;;  %v526_v42 = vrot.slane %v63_v31, %v84_v33 }
  0x10   :  { %v80_v35 = vcombine.high %v70_v30, %v70_v30  ;;  %v81_v37 = vcombine.high %v77_v32, %v77_v32  ;;  %v520_v39 = vrot.slane %v70_v30, %v84_v33  ;;  %v522_v40 = vrot.slane %v78_v34, %v84_v33 }
  0x11   :  { %v528_v43 = vrot.slane %v77_v32, %v84_v33  ;;  %v530_v44 = vrot.slane %v79_v36, %v84_v33 }
  0x12   :  { %233 = vperm.xlu1 %416, %v25_v9   ;;  %228 = vperm.xlu0 %415, %v24_v10   ;;  %v524_v41 = vrot.slane %v80_v35, %v84_v33  ;;  %v532_v45 = vrot.slane %v81_v37, %v84_v33 }
  0x16   :  { %243 = vperm.xlu1 %416, %v27_v11   ;;  %238 = vperm.xlu0 %415, %v26_v12  }
  0x1a   :  { %253 = vperm.xlu1 %416, %v29_v13   ;;  %248 = vperm.xlu0 %415, %v28_v14  }
  0x1e   :  { %263 = vperm.xlu1 %416, %v31_v15   ;;  %258 = vperm.xlu0 %415, %v30_v16  }
  0x81   :  { %v135_v46 = vpop.permute.xlu1 %134  ;;  %v125_v47 = vpop.permute.xlu0 %124 }
  0x82   :  { %v535_v48 = vmul.f32 %v135_v46, %v518_v38  ;;  %v538_v49 = vmul.f32 %v135_v46, %v520_v39  ;;  %v541_v50 = vmul.f32 %v135_v46, %v522_v40  ;;  %v544_v51 = vmul.f32 %v135_v46, %v524_v41 }
  0x83   :  { %v547_v52 = vmul.f32 %v135_v46, %v526_v42  ;;  %v550_v53 = vmul.f32 %v135_v46, %v528_v43  ;;  %v553_v54 = vmul.f32 %v135_v46, %v530_v44  ;;  %v556_v55 = vmul.f32 %v135_v46, %v532_v45 }
  0x84   :  { %v559_v56 = vmul.f32 %v125_v47, %v518_v38  ;;  %v562_v57 = vmul.f32 %v125_v47, %v520_v39  ;;  %v565_v58 = vmul.f32 %v125_v47, %v522_v40  ;;  %v568_v59 = vmul.f32 %v125_v47, %v524_v41 }
  0x85   :  { %v571_v60 = vmul.f32 %v125_v47, %v526_v42  ;;  %v574_v61 = vmul.f32 %v125_v47, %v528_v43  ;;  %v577_v62 = vmul.f32 %v125_v47, %v530_v44  ;;  %v580_v63 = vmul.f32 %v125_v47, %v532_v45  ;;  %v140_v0 = vpop.permute.xlu1 %139  ;;  %v130_v1 = vpop.permute.xlu0 %129 }
  0x86   :  { %v583_v2 = vmul.f32 %v140_v0, %v518_v38  ;;  %v586_v3 = vmul.f32 %v140_v0, %v520_v39  ;;  %v589_v4 = vmul.f32 %v140_v0, %v522_v40  ;;  %v592_v5 = vmul.f32 %v140_v0, %v524_v41 }
  0x87   :  { %v595_v6 = vmul.f32 %v140_v0, %v526_v42  ;;  %v598_v7 = vmul.f32 %v140_v0, %v528_v43  ;;  %v601_v8 = vmul.f32 %v140_v0, %v530_v44  ;;  %v604_v9 = vmul.f32 %v140_v0, %v532_v45 }
  0x88   :  { %v163_v10 = vmul.f32 %v130_v1, %v518_v38  ;;  %v171_v11 = vmul.f32 %v130_v1, %v520_v39  ;;  %v179_v12 = vmul.f32 %v130_v1, %v522_v40  ;;  %v187_v13 = vmul.f32 %v130_v1, %v524_v41 }
  0x89   :  { %v195_v14 = vmul.f32 %v130_v1, %v526_v42  ;;  %v203_v15 = vmul.f32 %v130_v1, %v528_v43  ;;  %v211_v16 = vmul.f32 %v130_v1, %v530_v44  ;;  %v219_v17 = vmul.f32 %v130_v1, %v532_v45  ;;  %v150_v18 = vpop.permute.xlu1 %149  ;;  %v145_v19 = vpop.permute.xlu0 %144 }
  0x8a   :  { %v615_v20 = vmul.f32 %v150_v18, %v518_v38  ;;  %v618_v21 = vmul.f32 %v150_v18, %v520_v39  ;;  %v621_v22 = vmul.f32 %v150_v18, %v522_v40  ;;  %v624_v23 = vmul.f32 %v150_v18, %v524_v41 }
  0x8b   :  { %v627_v24 = vmul.f32 %v150_v18, %v526_v42  ;;  %v630_v25 = vmul.f32 %v150_v18, %v528_v43  ;;  %v633_v26 = vmul.f32 %v150_v18, %v530_v44  ;;  %v636_v27 = vmul.f32 %v150_v18, %v532_v45 }
  0x8c   :  { %v639_v28 = vmul.f32 %v145_v19, %v518_v38  ;;  %v642_v29 = vmul.f32 %v145_v19, %v520_v39  ;;  %v645_v30 = vmul.f32 %v145_v19, %v522_v40  ;;  %v648_v31 = vmul.f32 %v145_v19, %v524_v41 }
  0x8d   :  { %v651_v32 = vmul.f32 %v145_v19, %v526_v42  ;;  %v654_v33 = vmul.f32 %v145_v19, %v528_v43  ;;  %v657_v34 = vmul.f32 %v145_v19, %v530_v44  ;;  %v660_v35 = vmul.f32 %v145_v19, %v532_v45  ;;  %v160_v36 = vpop.permute.xlu1 %159  ;;  %v155_v37 = vpop.permute.xlu0 %154 }
  0x8e   :  { %v663_v46 = vmul.f32 %v160_v36, %v518_v38  ;;  %v666_v47 = vmul.f32 %v160_v36, %v520_v39  ;;  %v669_v0 = vmul.f32 %v160_v36, %v522_v40  ;;  %v672_v1 = vmul.f32 %v160_v36, %v524_v41 }
  0x8f   :  { %789 = vst [vmem:[#allocation5_spill] sm:$0xff] %v654_v33  ;;  %790 = vst [vmem:[#allocation6_spill] sm:$0xff] %v657_v34  ;;  %v675_v18 = vmul.f32 %v160_v36, %v526_v42  ;;  %v678_v19 = vmul.f32 %v160_v36, %v528_v43  ;;  %v699_v33 = vmul.f32 %v155_v37, %v526_v42 }
  0x90   :  { %791 = vst [vmem:[#allocation7_spill] sm:$0xff] %v660_v35  ;;  %792 = vst [vmem:[#allocation8_spill] sm:$0xff] %v663_v46  ;;  %v681_v35 = vmul.f32 %v160_v36, %v530_v44  ;;  %v684_v46 = vmul.f32 %v160_v36, %v532_v45  ;;  %v702_v36 = vmul.f32 %v155_v37, %v528_v43 }
  0x91   :  { %793 = vst [vmem:[#allocation9_spill] sm:$0xff] %v666_v47  ;;  %794 = vst [vmem:[#allocation10_spill] sm:$0xff] %v669_v0  ;;  %v687_v47 = vmul.f32 %v155_v37, %v518_v38  ;;  %v690_v0 = vmul.f32 %v155_v37, %v520_v39  ;;  %v234_v34 = vpop.permute.xlu1 %233  ;;  %v705_v38 = vmul.f32 %v155_v37, %v530_v44 }
  0x92   :  { %795 = vst [vmem:[#allocation11_spill] sm:$0xff] %v672_v1  ;;  %796 = vst [vmem:[#allocation12_spill] sm:$0xff] %v675_v18  ;;  %v693_v1 = vmul.f32 %v155_v37, %v522_v40  ;;  %v696_v18 = vmul.f32 %v155_v37, %v524_v41  ;;  %v708_v39 = vmul.f32 %v155_v37, %v532_v45 }
  0x93   :  { %797 = vst [vmem:[#allocation13_spill] sm:$0xff] %v678_v19  ;;  %798 = vst [vmem:[#allocation14_spill] sm:$0xff] %v681_v35  ;;  %v229_v19 = vpop.permute.xlu0 %228  ;;  %v275_v40 = vadd.f32 %v234_v34, %v171_v11  ;;  %v299_v41 = vadd.f32 %v234_v34, %v195_v14  ;;  %v323_v35 = vadd.f32 %v234_v34, %v219_v17 }
  0x94   :  { %799 = vst [vmem:[#allocation15_spill] sm:$0xff] %v684_v46  ;;  %800 = vst [vmem:[#allocation16_spill] sm:$0xff] %v687_v47  ;;  %v291_v47 = vadd.f32 %v234_v34, %v187_v13  ;;  %v315_v46 = vadd.f32 %v234_v34, %v211_v16  ;;  %v266_v42 = vadd.f32 %v229_v19, %v559_v56 }
  0x95   :  { %801 = vst [vmem:[#allocation17_spill] sm:$0xff] %v690_v0  ;;  %802 = vst [vmem:[#allocation18_spill] sm:$0xff] %v693_v1  ;;  %v267_v0 = vadd.f32 %v234_v34, %v163_v10  ;;  %v283_v1 = vadd.f32 %v234_v34, %v179_v12  ;;  %v274_v43 = vadd.f32 %v229_v19, %v562_v57  ;;  %v244_v14 = vpop.permute.xlu1 %243 }
  0x96   :  { %803 = vst [vmem:[#allocation19_spill] sm:$0xff] %v696_v18  ;;  %v307_v18 = vadd.f32 %v234_v34, %v203_v15  ;;  %339 = vst [vmem:[#allocation2 + $0x48] sm:$0xff] %v275_v40  ;;  %v282_v44 = vadd.f32 %v229_v19, %v565_v58  ;;  %v290_v45 = vadd.f32 %v229_v19, %v568_v59 }
  0x97   :  { %331 = vst [vmem:[#allocation2 + $0x8] sm:$0xff] %v267_v0  ;;  %347 = vst [vmem:[#allocation2 + $0x88] sm:$0xff] %v283_v1  ;;  %v298_v10 = vadd.f32 %v229_v19, %v571_v60  ;;  %v306_v11 = vadd.f32 %v229_v19, %v574_v61  ;;  %v314_v12 = vadd.f32 %v229_v19, %v577_v62  ;;  %v239_v56 = vpop.permute.xlu0 %238 }
  0x98   :  { %355 = vst [vmem:[#allocation2 + $0xc8] sm:$0xff] %v291_v47  ;;  %363 = vst [vmem:[#allocation2 + $0x108] sm:$0xff] %v299_v41  ;;  %v322_v13 = vadd.f32 %v229_v19, %v580_v63  ;;  %v269_v57 = vadd.f32 %v244_v14, %v583_v2  ;;  %v277_v58 = vadd.f32 %v244_v14, %v586_v3  ;;  %v809_v0 = vld [vmem:[#allocation10_spill] sm:$0xff] }
  0x99   :  { %371 = vst [vmem:[#allocation2 + $0x148] sm:$0xff] %v307_v18  ;;  %379 = vst [vmem:[#allocation2 + $0x188] sm:$0xff] %v315_v46  ;;  %v285_v59 = vadd.f32 %v244_v14, %v589_v4  ;;  %v293_v60 = vadd.f32 %v244_v14, %v592_v5  ;;  %v301_v61 = vadd.f32 %v244_v14, %v595_v6  ;;  %v254_v16 = vpop.permute.xlu1 %253  ;;  %v810_v1 = vld [vmem:[#allocation11_spill] sm:$0xff]  ;;  %v811_v19 = vld [vmem:[#allocation12_spill] sm:$0xff] }
  0x9a   :  { %387 = vst [vmem:[#allocation2 + $0x1c8] sm:$0xff] %v323_v35  ;;  %330 = vst [vmem:[#allocation2] sm:$0xff] %v266_v42  ;;  %v309_v62 = vadd.f32 %v244_v14, %v598_v7  ;;  %v317_v63 = vadd.f32 %v244_v14, %v601_v8  ;;  %v325_v15 = vadd.f32 %v244_v14, %v604_v9  ;;  %v806_v35 = vld [vmem:[#allocation7_spill] sm:$0xff]  ;;  %v812_v41 = vld [vmem:[#allocation13_spill] sm:$0xff] }
  0x9b   :  { %338 = vst [vmem:[#allocation2 + $0x40] sm:$0xff] %v274_v43  ;;  %346 = vst [vmem:[#allocation2 + $0x80] sm:$0xff] %v282_v44  ;;  %v268_v2 = vadd.f32 %v239_v56, %v535_v48  ;;  %v276_v3 = vadd.f32 %v239_v56, %v538_v49  ;;  %v284_v4 = vadd.f32 %v239_v56, %v541_v50  ;;  %v249_v48 = vpop.permute.xlu0 %248  ;;  %v813_v43 = vld [vmem:[#allocation14_spill] sm:$0xff] }
  0x9c   :  { %354 = vst [vmem:[#allocation2 + $0xc0] sm:$0xff] %v290_v45  ;;  %362 = vst [vmem:[#allocation2 + $0x100] sm:$0xff] %v298_v10  ;;  %v292_v5 = vadd.f32 %v239_v56, %v544_v51  ;;  %v300_v6 = vadd.f32 %v239_v56, %v547_v52  ;;  %v308_v7 = vadd.f32 %v239_v56, %v550_v53  ;;  %v814_v45 = vld [vmem:[#allocation15_spill] sm:$0xff] }
  0x9d   :  { %370 = vst [vmem:[#allocation2 + $0x140] sm:$0xff] %v306_v11  ;;  %378 = vst [vmem:[#allocation2 + $0x180] sm:$0xff] %v314_v12  ;;  %v316_v8 = vadd.f32 %v239_v56, %v553_v54  ;;  %v324_v9 = vadd.f32 %v239_v56, %v556_v55  ;;  %v271_v49 = vadd.f32 %v254_v16, %v615_v20  ;;  %v264_v46 = vpop.permute.xlu1 %263  ;;  %v815_v11 = vld [vmem:[#allocation16_spill] sm:$0xff]  ;;  %v817_v56 = vld [vmem:[#allocation18_spill] sm:$0xff] }
  0x9e   :  { %386 = vst [vmem:[#allocation2 + $0x1c0] sm:$0xff] %v322_v13  ;;  %333 = vst [vmem:[#allocation2 + $0x18] sm:$0xff] %v269_v57  ;;  %v279_v50 = vadd.f32 %v254_v16, %v618_v21  ;;  %v287_v51 = vadd.f32 %v254_v16, %v621_v22  ;;  %v295_v52 = vadd.f32 %v254_v16, %v624_v23  ;;  %v816_v13 = vld [vmem:[#allocation17_spill] sm:$0xff] }
  0x9f   :  { %341 = vst [vmem:[#allocation2 + $0x58] sm:$0xff] %v277_v58  ;;  %349 = vst [vmem:[#allocation2 + $0x98] sm:$0xff] %v285_v59  ;;  %v303_v53 = vadd.f32 %v254_v16, %v627_v24  ;;  %v311_v54 = vadd.f32 %v254_v16, %v630_v25  ;;  %v319_v55 = vadd.f32 %v254_v16, %v633_v26  ;;  %v804_v25 = vld [vmem:[#allocation5_spill] sm:$0xff]  ;;  %v818_v58 = vld [vmem:[#allocation19_spill] sm:$0xff] }
  0xa0   :  { %357 = vst [vmem:[#allocation2 + $0xd8] sm:$0xff] %v293_v60  ;;  %365 = vst [vmem:[#allocation2 + $0x118] sm:$0xff] %v301_v61  ;;  %v327_v17 = vadd.f32 %v254_v16, %v636_v27  ;;  %v270_v20 = vadd.f32 %v249_v48, %v639_v28  ;;  %v278_v21 = vadd.f32 %v249_v48, %v642_v29  ;;  %v805_v27 = vld [vmem:[#allocation6_spill] sm:$0xff]  ;;  %v259_v28 = vpop.permute.xlu0 %258  ;;  %v807_v29 = vld [vmem:[#allocation8_spill] sm:$0xff] }
  0xa1   :  { %373 = vst [vmem:[#allocation2 + $0x158] sm:$0xff] %v309_v62  ;;  %381 = vst [vmem:[#allocation2 + $0x198] sm:$0xff] %v317_v63  ;;  %v286_v22 = vadd.f32 %v249_v48, %v645_v30  ;;  %v294_v23 = vadd.f32 %v249_v48, %v648_v31  ;;  %v302_v24 = vadd.f32 %v249_v48, %v651_v32  ;;  %v808_v31 = vld [vmem:[#allocation9_spill] sm:$0xff] }
  0xa2   :  { %389 = vst [vmem:[#allocation2 + $0x1d8] sm:$0xff] %v325_v15  ;;  %332 = vst [vmem:[#allocation2 + $0x10] sm:$0xff] %v268_v2  ;;  %v310_v26 = vadd.f32 %v249_v48, %v804_v25  ;;  %v318_v34 = vadd.f32 %v249_v48, %v805_v27  ;;  %v326_v37 = vadd.f32 %v249_v48, %v806_v35 }
  0xa3   :  { %340 = vst [vmem:[#allocation2 + $0x50] sm:$0xff] %v276_v3  ;;  %348 = vst [vmem:[#allocation2 + $0x90] sm:$0xff] %v284_v4  ;;  %v273_v30 = vadd.f32 %v264_v46, %v807_v29  ;;  %v281_v47 = vadd.f32 %v264_v46, %v808_v31  ;;  %v289_v32 = vadd.f32 %v264_v46, %v809_v0 }
  0xa4   :  { %356 = vst [vmem:[#allocation2 + $0xd0] sm:$0xff] %v292_v5  ;;  %364 = vst [vmem:[#allocation2 + $0x110] sm:$0xff] %v300_v6  ;;  %v297_v18 = vadd.f32 %v264_v46, %v810_v1  ;;  %v305_v40 = vadd.f32 %v264_v46, %v811_v19  ;;  %v313_v42 = vadd.f32 %v264_v46, %v812_v41 }
  0xa5   :  { %372 = vst [vmem:[#allocation2 + $0x150] sm:$0xff] %v308_v7  ;;  %380 = vst [vmem:[#allocation2 + $0x190] sm:$0xff] %v316_v8  ;;  %v321_v44 = vadd.f32 %v264_v46, %v813_v43  ;;  %v329_v10 = vadd.f32 %v264_v46, %v814_v45  ;;  %v272_v12 = vadd.f32 %v259_v28, %v815_v11 }
  0xa6   :  { %388 = vst [vmem:[#allocation2 + $0x1d0] sm:$0xff] %v324_v9  ;;  %335 = vst [vmem:[#allocation2 + $0x28] sm:$0xff] %v271_v49  ;;  %v280_v14 = vadd.f32 %v259_v28, %v816_v13  ;;  %v288_v57 = vadd.f32 %v259_v28, %v817_v56  ;;  %v296_v59 = vadd.f32 %v259_v28, %v818_v58 }
  0xa7   :  { %343 = vst [vmem:[#allocation2 + $0x68] sm:$0xff] %v279_v50  ;;  %351 = vst [vmem:[#allocation2 + $0xa8] sm:$0xff] %v287_v51  ;;  %v304_v60 = vadd.f32 %v259_v28, %v699_v33  ;;  %v312_v61 = vadd.f32 %v259_v28, %v702_v36  ;;  %v320_v62 = vadd.f32 %v259_v28, %v705_v38 }
  0xa8   :  { %359 = vst [vmem:[#allocation2 + $0xe8] sm:$0xff] %v295_v52  ;;  %367 = vst [vmem:[#allocation2 + $0x128] sm:$0xff] %v303_v53  ;;  %v328_v63 = vadd.f32 %v259_v28, %v708_v39 }
  0xa9   :  { %375 = vst [vmem:[#allocation2 + $0x168] sm:$0xff] %v311_v54  ;;  %383 = vst [vmem:[#allocation2 + $0x1a8] sm:$0xff] %v319_v55 }
  0xaa   :  { %391 = vst [vmem:[#allocation2 + $0x1e8] sm:$0xff] %v327_v17  ;;  %334 = vst [vmem:[#allocation2 + $0x20] sm:$0xff] %v270_v20 }
  0xab   :  { %342 = vst [vmem:[#allocation2 + $0x60] sm:$0xff] %v278_v21  ;;  %350 = vst [vmem:[#allocation2 + $0xa0] sm:$0xff] %v286_v22 }
  0xac   :  { %358 = vst [vmem:[#allocation2 + $0xe0] sm:$0xff] %v294_v23  ;;  %366 = vst [vmem:[#allocation2 + $0x120] sm:$0xff] %v302_v24 }
  0xad   :  { %374 = vst [vmem:[#allocation2 + $0x160] sm:$0xff] %v310_v26  ;;  %382 = vst [vmem:[#allocation2 + $0x1a0] sm:$0xff] %v318_v34 }
  0xae   :  { %390 = vst [vmem:[#allocation2 + $0x1e0] sm:$0xff] %v326_v37  ;;  %337 = vst [vmem:[#allocation2 + $0x38] sm:$0xff] %v273_v30 }
  0xaf   :  { %345 = vst [vmem:[#allocation2 + $0x78] sm:$0xff] %v281_v47  ;;  %353 = vst [vmem:[#allocation2 + $0xb8] sm:$0xff] %v289_v32 }
  0xb0   :  { %361 = vst [vmem:[#allocation2 + $0xf8] sm:$0xff] %v297_v18  ;;  %369 = vst [vmem:[#allocation2 + $0x138] sm:$0xff] %v305_v40 }
  0xb1   :  { %377 = vst [vmem:[#allocation2 + $0x178] sm:$0xff] %v313_v42  ;;  %385 = vst [vmem:[#allocation2 + $0x1b8] sm:$0xff] %v321_v44 }
  0xb2   :  { %393 = vst [vmem:[#allocation2 + $0x1f8] sm:$0xff] %v329_v10  ;;  %336 = vst [vmem:[#allocation2 + $0x30] sm:$0xff] %v272_v12 }
  0xb3   :  { %344 = vst [vmem:[#allocation2 + $0x70] sm:$0xff] %v280_v14  ;;  %352 = vst [vmem:[#allocation2 + $0xb0] sm:$0xff] %v288_v57 }
  0xb4   :  { %360 = vst [vmem:[#allocation2 + $0xf0] sm:$0xff] %v296_v59  ;;  %368 = vst [vmem:[#allocation2 + $0x130] sm:$0xff] %v304_v60 }
  0xb5   :  { %376 = vst [vmem:[#allocation2 + $0x170] sm:$0xff] %v312_v61  ;;  %384 = vst [vmem:[#allocation2 + $0x1b0] sm:$0xff] %v320_v62 }
  0xb6   :  { %392 = vst [vmem:[#allocation2 + $0x1f0] sm:$0xff] %v328_v63 }
  0xb7   :  { %429 = shalt.err (!%p426_p4)
}
  0xb8   :  { %s430_s21 = scalar_lea.hbm %s788_s3, 8192 }
  0xb9   :  { %p431_p5 = scmp.ne.s32.totalorder %s788_s3, %s430_s21  ;;  %p434_p6 = scmp.lt.u32.totalorder %s430_s21, %s788_s3 }
  0xbb   :  { %p436_p7 = pnand %p434_p6, %p431_p5 }
  0xbd   :  { %439 = shalt.err (!%p436_p7)
}
  0xbe   :  { %s445_s26 = smov 128   ;;  %s446_s27 = smov 8  }
  0xbf   :  { %405 = dma.vmem_to_hbm [thread:$0]  %s762_s2, 8192, %s788_s3, [#allocation3], %s445_s26, %s445_s26, %s446_s27  }
  0xc0   :  { %440 = dma.done.wait [#allocation3], 8192  }
  0xc1   :  { %441 = vsyncadd [#allocation3], 4294959104 }
  0xc2   :  { %409 = vsyncpa [#allocation3], 1 }

</bundles_post_ra>
